<compile_context>
chip_gen: v6e
topology: v6e:2x2x1
jax: 0.10.0
libtpu: 0.0.40
codegen_flags: <defaults>
</compile_context>

<pallas_src>
import functools
import math

import jax
import jax.numpy as jnp
from jax.experimental import pallas as pl
from jax.experimental.pallas import tpu as pltpu


# ------------------------------ small helpers -------------------------------

def _ln_f32(x, gamma, beta):
    """LayerNorm in f32 with one-pass (independent) E[x], E[x^2] reductions."""
    m = jnp.mean(x, axis=-1, keepdims=True)
    m2 = jnp.mean(x * x, axis=-1, keepdims=True)
    var = jnp.maximum(m2 - m * m, 0.0)
    return (x - m) * jax.lax.rsqrt(var + 1e-5) * gamma + beta


# ----------------------------- Pallas kernels ------------------------------

def _layernorm_kernel(x_ref, g_ref, beta_ref, o_ref):
    x = x_ref[...].astype(jnp.float32)
    o_ref[...] = _ln_f32(x, g_ref[...], beta_ref[...]).astype(o_ref.dtype)


def _encoder_layer_kernel(x_ref, mask_ref, wqkv_ref, bqkv_ref, wo_ref, bo_ref,
                          ln1_g_ref, ln1_b_ref, w1_ref, bf1_ref, w2_ref,
                          bf2_ref, ln2_g_ref, ln2_b_ref, o_ref, *, heads):
    # x_ref: (S, D) bf16 for one batch element; mask_ref: (1, S) f32 (1 = keep).
    x = x_ref[...]
    S, D = x.shape
    Dh = D // heads

    # ---- fused QKV projection (1/sqrt(Dh) already folded into Q weights) ----
    qkv = (jnp.dot(x, wqkv_ref[...], preferred_element_type=jnp.float32)
           + bqkv_ref[...]).astype(jnp.bfloat16)              # (S, 3D), one cast

    q = qkv[:, 0 * D:1 * D].reshape(S, heads, Dh).swapaxes(0, 1)   # (H, S, Dh)
    k = qkv[:, 1 * D:2 * D].reshape(S, heads, Dh).swapaxes(0, 1)
    v = qkv[:, 2 * D:3 * D].reshape(S, heads, Dh).swapaxes(0, 1)

    neg = (1.0 - mask_ref[...]) * (-1e9)                      # (1, S) f32

    # ---- heads-batched attention (single MXU pass per matmul) ----
    s = jnp.einsum('hqd,hkd->hqk', q, k,
                   preferred_element_type=jnp.float32)        # (H, S, S) f32
    s = s + neg[None]                                         # mask keys
    s = s - jnp.max(s, axis=-1, keepdims=True)
    p = jnp.exp(s)
    # approx reciprocal -> EUP slot; ~1e-3 relative error, fine for inference.
    p = p * pl.reciprocal(jnp.sum(p, axis=-1, keepdims=True), approx=True)
    ctx = jnp.einsum('hqk,hkd->hqd', p.astype(jnp.bfloat16), v,
                     preferred_element_type=jnp.float32)      # (H, S, Dh) f32
    ctx = ctx.swapaxes(0, 1).reshape(S, D)                    # (S, D) f32

    attn = jnp.dot(ctx.astype(jnp.bfloat16), wo_ref[...],
                   preferred_element_type=jnp.float32) + bo_ref[...]

    # ---- residual + LayerNorm1 (f32) ----
    h1 = _ln_f32(attn + x.astype(jnp.float32), ln1_g_ref[...], ln1_b_ref[...])

    # ---- FFN (tanh GELU) + residual + LayerNorm2 ----
    f = jnp.dot(h1.astype(jnp.bfloat16), w1_ref[...],
                preferred_element_type=jnp.float32) + bf1_ref[...]
    f = jax.nn.gelu(f, approximate=True)                      # tanh -> EUP
    y = jnp.dot(f.astype(jnp.bfloat16), w2_ref[...],
                preferred_element_type=jnp.float32) + bf2_ref[...]
    out = _ln_f32(y + h1, ln2_g_ref[...], ln2_b_ref[...])
    o_ref[...] = out.astype(o_ref.dtype)


# ------------------------------ kernel wrappers -----------------------------

@functools.lru_cache(maxsize=None)
def _vmem_limit_bytes():
    # Generation-aware scoped-VMEM budget: ~75% of physical, capped at 96 MiB.
    # v5e/v6e (128 MiB) -> 96 MiB; v7x (64 MiB) -> ~48 MiB.  Fallback 48 MiB.
    cap = 64 * 1024 * 1024
    try:
        info_fn = getattr(pltpu, "get_tpu_info", None)
        if info_fn is not None:
            cap = int(info_fn().vmem_capacity_bytes)
    except Exception:
        pass
    return int(min(cap * 3 // 4, 96 * 1024 * 1024))


def _cp(semantics):
    return pltpu.CompilerParams(dimension_semantics=semantics,
                                vmem_limit_bytes=_vmem_limit_bytes())


def _full_spec(arr):
    nd = arr.ndim
    return pl.BlockSpec(arr.shape, lambda *args, _nd=nd: (0,) * _nd)


def _row_tile(m):
    # Largest bf16-friendly (multiple-of-16) row tile that divides M.
    for tm in (2048, 1024, 512, 256, 128, 64, 32, 16, 8):
        if m % tm == 0:
            return tm
    return m


def layernorm(x, gamma, beta):
    M, D = x.shape
    tm = _row_tile(M)
    row_spec = pl.BlockSpec((tm, D), lambda i: (i, 0))
    return pl.pallas_call(
        _layernorm_kernel,
        out_shape=jax.ShapeDtypeStruct((M, D), jnp.bfloat16),
        grid=(M // tm,),
        in_specs=[row_spec, _full_spec(gamma), _full_spec(beta)],
        out_specs=row_spec,
        compiler_params=_cp(("parallel",)),
    )(x, gamma, beta)


def encoder_layer(x, mask3, p, heads):
    # x: (B, S, D) bf16; mask3: (B, 1, S) f32.
    B, S, D = x.shape
    x_spec = pl.BlockSpec((None, S, D), lambda b: (b, 0, 0))
    m_spec = pl.BlockSpec((None, 1, S), lambda b: (b, 0, 0))
    weights = (p["wqkv"], p["bqkv"], p["wo"], p["bo"],
               p["ln1_g"], p["ln1_b"],
               p["w1"], p["b1"], p["w2"], p["b2"],
               p["ln2_g"], p["ln2_b"])
    # TODO(synk): on v7x, single-buffer the constant-index weight specs
    # (pl.Buffered(1)) and add a query-tile grid axis for megacore balance.
    return pl.pallas_call(
        functools.partial(_encoder_layer_kernel, heads=heads),
        out_shape=jax.ShapeDtypeStruct((B, S, D), jnp.bfloat16),
        grid=(B,),
        in_specs=[x_spec, m_spec] + [_full_spec(w) for w in weights],
        out_specs=x_spec,
        compiler_params=_cp(("parallel",)),
    )(x, mask3, *weights)


# ------------------------------- model (glue) -------------------------------

def roberta_forward(params, input_ids, attn_mask):
    cfg = params["cfg"]
    B, S = input_ids.shape
    D = cfg["hidden"]

    # RoBERTa-style position ids (offset by padding_idx, pads get padding_idx).
    not_pad = (input_ids != cfg["pad_id"]).astype(jnp.int32)
    position_ids = jnp.cumsum(not_pad, axis=1) * not_pad + cfg["pad_id"]

    word_e = jnp.take(params["word_emb"], input_ids, axis=0)
    pos_e = jnp.take(params["pos_emb"], position_ids, axis=0)
    type_e = params["type_emb"][0]                   # token_type_id == 0
    emb = (word_e + pos_e + type_e).reshape(B * S, D)

    h = layernorm(emb, params["emb_ln_g"], params["emb_ln_b"]).reshape(B, S, D)

    mask3 = attn_mask.astype(jnp.float32).reshape(B, 1, S)
    for layer_p in params["layers"]:
        h = encoder_layer(h, mask3, layer_p, cfg["heads"])     # (B, S, D) bf16

    # classification head: <s> (CLS) token -> dense + tanh -> out_proj
    # (dropout = identity); tiny matmuls, kept in plain jnp (f32).
    cls = h[:, 0, :].astype(jnp.float32)                       # (B, D)
    dense = jnp.tanh(cls @ params["cls_dense_w"] + params["cls_dense_b"])
    logits = dense @ params["cls_out_w"] + params["cls_out_b"]
    return logits                                              # (B, labels) f32


# ------------------------------- init params --------------------------------

def init_params(key, vocab=100, hidden=32, n_layers=2, heads=2, ffn=64,
                max_pos=64, pad_id=1, num_labels=2):
    n_keys = 8 + n_layers * 8
    keys = iter(jax.random.split(key, n_keys))

    def w(shape):
        return jax.random.normal(next(keys), shape, jnp.float32) * 0.02

    def bf(x):
        return x.astype(jnp.bfloat16)

    params = {
        "cfg": {"hidden": hidden, "heads": heads, "pad_id": pad_id},
        "word_emb": w((vocab, hidden)).at[pad_id].set(0.0),
        "pos_emb": w((max_pos, hidden)),
        "type_emb": w((1, hidden)),
        "emb_ln_g": jnp.ones((1, hidden), jnp.float32),
        "emb_ln_b": jnp.zeros((1, hidden), jnp.float32),
        "cls_dense_w": w((hidden, hidden)),
        "cls_dense_b": jnp.zeros((hidden,), jnp.float32),
        "cls_out_w": w((hidden, num_labels)),
        "cls_out_b": jnp.zeros((num_labels,), jnp.float32),
        "layers": [],
    }
    scale = 1.0 / math.sqrt(hidden // heads)
    for _ in range(n_layers):
        wq, wk, wv = w((hidden, hidden)), w((hidden, hidden)), w((hidden, hidden))
        # Attention scale folded into the Q projection (weight and bias).
        params["layers"].append({
            "wqkv": bf(jnp.concatenate([wq * scale, wk, wv], axis=1)),  # (D,3D)
            "bqkv": jnp.zeros((1, 3 * hidden), jnp.float32),            # q-part pre-scaled (zeros)
            "wo": bf(w((hidden, hidden))),
            "bo": jnp.zeros((1, hidden), jnp.float32),
            "ln1_g": jnp.ones((1, hidden), jnp.float32),
            "ln1_b": jnp.zeros((1, hidden), jnp.float32),
            "w1": bf(w((hidden, ffn))),
            "b1": jnp.zeros((1, ffn), jnp.float32),
            "w2": bf(w((ffn, hidden))),
            "b2": jnp.zeros((1, hidden), jnp.float32),
            "ln2_g": jnp.ones((1, hidden), jnp.float32),
            "ln2_b": jnp.zeros((1, hidden), jnp.float32),
        })
    return params


# ---------------------------------- main -------------------------------------

if __name__ == "__main__":
    # TODO(synk): tokenizer loading, AMP training loop, checkpoint IO and dropout
    # randomness from the reference module are host-side / training-only and are
    # not part of the Pallas forward kernels.
    key = jax.random.PRNGKey(0)
    B, S = 2, 8
    VOCAB, HIDDEN, LAYERS, HEADS, FFN, PAD_ID, NUM_LABELS = 100, 32, 2, 2, 64, 1, 2

    params = init_params(key, vocab=VOCAB, hidden=HIDDEN, n_layers=LAYERS,
                         heads=HEADS, ffn=FFN, max_pos=64, pad_id=PAD_ID,
                         num_labels=NUM_LABELS)

    k_ids, _ = jax.random.split(key)
    input_ids = jax.random.randint(k_ids, (B, S), 2, VOCAB, dtype=jnp.int32)
    attn_mask = jnp.ones((B, S), jnp.int32)
    # pad the tail of the second sequence
    input_ids = input_ids.at[1, 6:].set(PAD_ID)
    attn_mask = attn_mask.at[1, 6:].set(0)

    logits = roberta_forward(params, input_ids, attn_mask)
    logits = jax.block_until_ready(logits)
    assert logits.shape == (B, NUM_LABELS) and logits.dtype == jnp.float32
    assert bool(jnp.all(jnp.isfinite(logits)))
    print("KERNEL_OK")
</pallas_src>

<mosaic_0001>
module attributes {stable_mosaic.version = 11 : i64} {
  func.func @_layernorm_kernel(%arg0: i32, %arg1: memref<16x32xf32, #tpu.memory_space<vmem>>, %arg2: memref<1x32xf32, #tpu.memory_space<vmem>>, %arg3: memref<1x32xf32, #tpu.memory_space<vmem>>, %arg4: memref<16x32xbf16, #tpu.memory_space<vmem>>) attributes {dimension_semantics = [#tpu.dimension_semantics<parallel>], iteration_bounds = array<i64: 1>, scalar_prefetch = 0 : i64, scratch_operands = 0 : i64, tpu.core_type = #tpu.core_type<tc>, window_params = [{transform_indices = @transform_0, window_bounds = array<i64: 16, 32>}, {pipeline_mode = #tpu.pipeline_mode<synchronous>, transform_indices = @transform_1, window_bounds = array<i64: 1, 32>}, {pipeline_mode = #tpu.pipeline_mode<synchronous>, transform_indices = @transform_2, window_bounds = array<i64: 1, 32>}, {transform_indices = @transform_3, window_bounds = array<i64: 16, 32>}]} {
    %c0 = arith.constant 0 : index
    %c0_0 = arith.constant 0 : index
    %0 = vector.load %arg1[%c0, %c0_0] : memref<16x32xf32, #tpu.memory_space<vmem>>, vector<16x32xf32>
    %c0_1 = arith.constant 0 : index
    %c0_2 = arith.constant 0 : index
    %1 = vector.load %arg2[%c0_1, %c0_2] : memref<1x32xf32, #tpu.memory_space<vmem>>, vector<1x32xf32>
    %c0_3 = arith.constant 0 : index
    %c0_4 = arith.constant 0 : index
    %2 = vector.load %arg3[%c0_3, %c0_4] : memref<1x32xf32, #tpu.memory_space<vmem>>, vector<1x32xf32>
    %cst = arith.constant dense<0.000000e+00> : vector<16xf32>
    %3 = vector.multi_reduction <add>, %0, %cst [1] : vector<16x32xf32> to vector<16xf32>
    %4 = vector.shape_cast %3 : vector<16xf32> to vector<16x1xf32>
    %cst_5 = arith.constant 3.200000e+01 : f32
    %5 = vector.broadcast %cst_5 : f32 to vector<16x1xf32>
    %6 = arith.divf %4, %5 : vector<16x1xf32>
    %7 = arith.mulf %0, %0 : vector<16x32xf32>
    %cst_6 = arith.constant dense<0.000000e+00> : vector<16xf32>
    %8 = vector.multi_reduction <add>, %7, %cst_6 [1] : vector<16x32xf32> to vector<16xf32>
    %9 = vector.shape_cast %8 : vector<16xf32> to vector<16x1xf32>
    %cst_7 = arith.constant 3.200000e+01 : f32
    %10 = vector.broadcast %cst_7 : f32 to vector<16x1xf32>
    %11 = arith.divf %9, %10 : vector<16x1xf32>
    %12 = arith.mulf %6, %6 : vector<16x1xf32>
    %13 = arith.subf %11, %12 : vector<16x1xf32>
    %cst_8 = arith.constant 0.000000e+00 : f32
    %14 = vector.broadcast %cst_8 : f32 to vector<16x1xf32>
    %15 = arith.maximumf %13, %14 : vector<16x1xf32>
    %16 = vector.broadcast %6 : vector<16x1xf32> to vector<16x32xf32>
    %17 = arith.subf %0, %16 : vector<16x32xf32>
    %cst_9 = arith.constant 9.99999974E-6 : f32
    %18 = vector.broadcast %cst_9 : f32 to vector<16x1xf32>
    %19 = arith.addf %15, %18 : vector<16x1xf32>
    %20 = math.rsqrt %19 : vector<16x1xf32>
    %21 = vector.broadcast %20 : vector<16x1xf32> to vector<16x32xf32>
    %22 = arith.mulf %17, %21 : vector<16x32xf32>
    %23 = vector.broadcast %1 : vector<1x32xf32> to vector<16x32xf32>
    %24 = arith.mulf %22, %23 : vector<16x32xf32>
    %25 = vector.broadcast %2 : vector<1x32xf32> to vector<16x32xf32>
    %26 = arith.addf %24, %25 : vector<16x32xf32>
    %27 = arith.truncf %26 : vector<16x32xf32> to vector<16x32xbf16>
    %c0_10 = arith.constant 0 : index
    %c0_11 = arith.constant 0 : index
    %28 = vector.load %arg4[%c0_10, %c0_11] : memref<16x32xbf16, #tpu.memory_space<vmem>>, vector<16x32xbf16>
    tpu.vector_store %arg4[%c0_10, %c0_11], %27 {strides = array<i32>} : memref<16x32xbf16, #tpu.memory_space<vmem>>, vector<16x32xbf16>,
    return
  }
  func.func @transform_0(%arg0: i32) -> (i32, i32) {
    %c0_i32 = arith.constant 0 : i32
    %c0_i32_0 = arith.constant 0 : i32
    return %arg0, %c0_i32 : i32, i32
  }
  func.func @transform_1(%arg0: i32) -> (i32, i32) {
    %c0_i32 = arith.constant 0 : i32
    %c0_i32_0 = arith.constant 0 : i32
    %c0_i32_1 = arith.constant 0 : i32
    return %c0_i32, %c0_i32_0 : i32, i32
  }
  func.func @transform_2(%arg0: i32) -> (i32, i32) {
    %c0_i32 = arith.constant 0 : i32
    %c0_i32_0 = arith.constant 0 : i32
    %c0_i32_1 = arith.constant 0 : i32
    return %c0_i32, %c0_i32_0 : i32, i32
  }
  func.func @transform_3(%arg0: i32) -> (i32, i32) {
    %c0_i32 = arith.constant 0 : i32
    %c0_i32_0 = arith.constant 0 : i32
    return %arg0, %c0_i32 : i32, i32
  }
}

</mosaic_0001>

<bundles_post_ra>
// kernel: tpu_custom_call.1
= control target key start
LH: loop header
LB: loop body
LE: loop exit
PB: predicated region body
PF: predicated region fallthrough
CT: control target
= control target key end

     0   :  { %8 = vsyncpa [#allocation3], 0  ;;  %s209_s0 = inlined_call_operand.hbm [shape: f32[16,32], index: 0, kind: input, shape index: {}]   ;;  %s210_s1 = inlined_call_operand.vmem [shape: f32[1,32], index: 1, kind: input, shape index: {}]   ;;  %s211_s2 = inlined_call_operand.vmem [shape: f32[1,32], index: 2, kind: input, shape index: {}]   ;;  %s212_s3 = inlined_call_operand.hbm [shape: bf16[16,32], index: 3, kind: output, shape index: {}]  }
   0x1   :  { %9 = vsyncpa [#allocation4], 0  ;;  %s171_s12 = smov [#allocation2]  }
   0x2   :  { %s15_s13 = sshll.u32 %s171_s12, 4  ;;  %s16_s13 = int_to_ptr.vmem [resolvable:$true] %s15_s13 }
   0x3   :  { %s135_s14 = scalar_lea.vmem %s16_s13, 256  ;;  %p140_p1 = scmp.lt.s32.totalorder %s16_s13, %s16_s13 }
   0x4   :  { %p136_p0 = scmp.ne.s32.totalorder %s16_s13, %s135_s14  ;;  %p141_p2 = scmp.lt.s32.totalorder %s135_s14, %s135_s14 }
   0x6   :  { %p142_p3 = por %p141_p2, %p140_p1 }
   0x8   :  { %p143_p4 = pnand %p142_p3, %p136_p0 }
   0xa   :  { %146 = shalt.err (!%p143_p4)
}
   0xb   :  { %s172_s15 = smov 128   ;;  %s173_s16 = smov 8  }
   0xc   :  { %21 = dma.hbm_to_vmem [thread:$0]  %s209_s0, 256, %s16_s13, [#allocation3], %s172_s15, %s172_s15, %s173_s16  }
   0xd   :  { %167 = dma.done.wait [#allocation3], 256  }
   0xe   :  { %168 = vsyncadd [#allocation3], 4294967040  ;;  %vm33_vm0 = vcmask 261120   ;;  %v29_v0 = vld [vmem:[#allocation2] sm:$0xff]  ;;  %v30_v1 = vld [vmem:[#allocation2 + $0x8] sm:$0xff]  ;;  %vm91_vm1 = vcmask 257024  }
   0xf   :  { %v34_v2 = vsel %vm33_vm0, %v29_v0, 0.0  ;;  %v43_v3 = vmul.f32 %v29_v0, %v29_v0  ;;  %v44_v4 = vmul.f32 %v30_v1, %v30_v1  ;;  %v37_v6 = vsel %vm33_vm0, %v30_v1, 0.0  ;;  %v111_v26 = vld [vmem:[%s210_s1] ss:$0 sm:$0xff]  ;;  %s174_s22 = smov [#allocation5]  }
  0x10   :  { %35 = vadd.xlane.f32.xlu0 %v34_v2  ;;  %v112_v28 = vld [vmem:[%s211_s2] ss:$0 sm:$0xff]  ;;  %s99_s23 = sshll.u32 %s174_s22, 4  ;;  %s100_s23 = int_to_ptr.vmem [resolvable:$true] %s99_s23 }
  0x11   :  { %v45_v5 = vsel %vm33_vm0, %v43_v3, 0.0  ;;  %v48_v7 = vsel %vm33_vm0, %v44_v4, 0.0  ;;  %s147_s1 = scalar_lea.vmem %s100_s23, 128  ;;  %p152_p6 = scmp.lt.s32.totalorder %s100_s23, %s100_s23 }
  0x12   :  { %46 = vadd.xlane.f32.xlu1 %v45_v5  ;;  %p148_p5 = scmp.ne.s32.totalorder %s100_s23, %s147_s1  ;;  %p153_p7 = scmp.lt.s32.totalorder %s147_s1, %s147_s1 }
  0x14   :  { %38 = vadd.xlane.f32.xlu0 %v37_v6  ;;  %p154_p8 = por %p153_p7, %p152_p6 }
  0x16   :  { %49 = vadd.xlane.f32.xlu1 %v48_v7  ;;  %p155_p9 = pnand %p154_p8, %p148_p5 }
  0x99   :  { %v36_v8 = vpop.xlane.xlu0 %35 }
  0x9a   :  { %v41_v9 = vmul.f32 0.03125, %v36_v8 }
  0x9b   :  { %v47_v10 = vpop.xlane.xlu1 %46 }
  0x9c   :  { %v53_v11 = vmul.f32 %v41_v9, %v41_v9  ;;  %v51_v12 = vmul.f32 0.03125, %v47_v10  ;;  %v59_v24 = vsub.f32 %v29_v0, %v41_v9 }
  0x9d   :  { %v39_v13 = vpop.xlane.xlu0 %38 }
  0x9e   :  { %v55_v14 = vsub.f32 %v51_v12, %v53_v11  ;;  %v42_v15 = vmul.f32 0.03125, %v39_v13 }
  0x9f   :  { %v50_v16 = vpop.xlane.xlu1 %49 }
  0xa0   :  { %v57_v17 = vmax.f32 %v55_v14, 0.0  ;;  %v54_v18 = vmul.f32 %v42_v15, %v42_v15  ;;  %v52_v19 = vmul.f32 0.03125, %v50_v16  ;;  %v60_v29 = vsub.f32 %v30_v1, %v42_v15 }
  0xa2   :  { %v61_v20 = vadd.f32 1e-05, %v57_v17  ;;  %v56_v21 = vsub.f32 %v52_v19, %v54_v18 }
  0xa4   :  { %123 = vrsqrt.f32 %v61_v20  ;;  %v58_v22 = vmax.f32 %v56_v21, 0.0 }
  0xa6   :  { %v62_v23 = vadd.f32 1e-05, %v58_v22 }
  0xa8   :  { %125 = vrsqrt.f32 %v62_v23 }
  0xb1   :  { %v124_v25 = vpop.eup %123 }
  0xb2   :  { %v65_v27 = vmul.f32 %v124_v25, %v59_v24 }
  0xb4   :  { %v73_v30 = vmul.f32 %v111_v26, %v65_v27 }
  0xb5   :  { %v126_v31 = vpop.eup %125 }
  0xb6   :  { %v66_v32 = vmul.f32 %v126_v31, %v60_v29  ;;  %v81_v33 = vadd.f32 %v112_v28, %v73_v30 }
  0xb8   :  { %v74_v34 = vmul.f32 %v111_v26, %v66_v32  ;;  %v115_v35 = vpack.c.bf16 %v81_v33, %v81_v33 }
  0xba   :  { %v82_v36 = vadd.f32 %v112_v28, %v74_v34  ;;  %92 = vst.msk [vmem:[#allocation5] sm:$0xf] %vm91_vm1, %v115_v35 }
  0xbc   :  { %v116_v37 = vpack.c.bf16 %v82_v36, %v82_v36 }
  0xbe   :  { %93 = vst.msk [vmem:[#allocation5 + $0x4] sm:$0xf] %vm91_vm1, %v116_v37 }
  0xbf   :  { %158 = shalt.err (!%p155_p9)
}
  0xc0   :  { %s175_s2 = smov 64   ;;  %s176_s24 = smov 4  }
  0xc1   :  { %105 = dma.vmem_to_hbm [thread:$0]  %s100_s23, 128, %s212_s3, [#allocation4], %s175_s2, %s175_s2, %s176_s24  }
  0xc2   :  { %169 = dma.done.wait [#allocation4], 128  }
  0xc3   :  { %170 = vsyncadd [#allocation4], 4294967168 }
  0xc4   :  { %109 = vsyncpa [#allocation3], 1 }
  0xc5   :  { %110 = vsyncpa [#allocation4], 1 }

</bundles_post_ra>
